<compile_context>
chip_gen: v7x
topology: tpu7x:2x2x1
jax: 0.10.0
libtpu: 0.0.40
codegen_flags: <defaults>
</compile_context>

<pallas_src>
import functools

import jax
import jax.numpy as jnp
from jax import lax
from jax.experimental import pallas as pl
from jax.experimental.pallas import tpu as pltpu


def _round_up(n: int, m: int) -> int:
    return ((n + m - 1) // m) * m


def _cdiv(a: int, b: int) -> int:
    return -(-a // b)


def _choose_tiling(B: int, block_batch: int, lane_chunk: int):
    """Balanced batch tiling: (num_tiles, TB, chunk, n_chunks, B_pad).

    TB and chunk are multiples of 128; total padding is bounded by roughly
    num_tiles * chunk instead of a full tile (review item #2).
    """
    CH = max(128, _round_up(lane_chunk, 128))
    B128 = _round_up(B, 128)
    TB_cap = max(CH, _round_up(block_batch, CH))
    num_tiles = max(1, _cdiv(B128, TB_cap))
    target = _cdiv(B128, num_tiles)          # per-tile batch target
    n_chunks = max(1, _cdiv(target, CH))
    chunk = _round_up(_cdiv(target, n_chunks), 128)
    TB = n_chunks * chunk
    B_pad = num_tiles * TB
    return num_tiles, TB, chunk, n_chunks, B_pad


def _pimanet_kernel(xt_ref, w1_ref, b1_ref, w2_ref, b2_ref, w3_ref, b3_ref,
                    o_ref, *, chunk, n_chunks, head_on_vpu):
    """One batch tile, transposed layout: every activation is (features, lanes).

    The tile is processed in `n_chunks` lane-chunks of `chunk` columns so the
    (64, chunk) f32 intermediates stay small regardless of the tile size.
    """
    mm = functools.partial(jnp.dot, preferred_element_type=jnp.float32)

    # Hoist weight loads and bias/weight broadcasts out of the chunk loop
    # (JAX does not CSE broadcast_in_dim inside loops).
    w1 = w1_ref[...]                                              # (64, 8)
    w2 = w2_ref[...]                                              # (64, 64)
    b1b = jnp.broadcast_to(b1_ref[...], (w1.shape[0], chunk))     # (64, chunk) f32
    b2b = jnp.broadcast_to(b2_ref[...], (w2.shape[0], chunk))     # (64, chunk) f32
    b3b = jnp.broadcast_to(b3_ref[...], (b3_ref.shape[0], chunk)) # (C,  chunk) f32
    if head_on_vpu:
        # w3 arrives pre-transposed as (64, 1) f32 -> broadcast along lanes.
        w3b = jnp.broadcast_to(w3_ref[...], (w3_ref.shape[0], chunk))
    else:
        w3m = w3_ref[...]                                         # (C, 64)

    def process(start):
        xs = xt_ref[:, pl.ds(start, chunk)]                       # (8, chunk)
        # Layer 1: Linear(8 -> 64) + ReLU on the MXU, f32 accumulation.
        h1 = jnp.maximum(mm(w1, xs) + b1b, 0.0)                   # (64, chunk) f32
        # Layer 2: Linear(64 -> 64) + ReLU (bf16 MXU operands, f32 accum).
        h2 = jnp.maximum(mm(w2, h1.astype(w2.dtype)) + b2b, 0.0)  # (64, chunk) f32
        if head_on_vpu:
            # Layer 3 head (M=1): VPU multiply + sublane (XLU) reduce instead
            # of burning MXU pushes; stays in f32, no extra cast.
            logits = jnp.sum(w3b * h2, axis=0, keepdims=True) + b3b
        else:
            logits = mm(w3m, h2.astype(w3m.dtype)) + b3b          # (C, chunk) f32
        # Exact sigmoid: exp on the EUP, then a divide; output is lane-dense.
        probs = 1.0 / (1.0 + jnp.exp(-logits))
        o_ref[:, pl.ds(start, chunk)] = probs.astype(o_ref.dtype)

    if n_chunks == 1:
        process(0)
    else:
        def body(c, carry):
            process(pl.multiple_of(c * chunk, 128))
            return carry
        lax.fori_loop(0, n_chunks, body, None)


def pimanet_forward(x, params, *, block_batch=131072, lane_chunk=2048,
                    compute_dtype=jnp.bfloat16):
    """Fused PimaNet forward pass.

    x       : (B, 8) float32
    params  : PyTorch-layout weights
              w1 (64, 8),  b1 (64, 1)
              w2 (64, 64), b2 (64, 1)
              w3 (C, 64),  b3 (C, 1)
    returns : (B, C) float32 sigmoid probabilities
    """
    B, F = x.shape
    assert F == 8, f"PimaNet expects 8 input features, got {F}"
    C = params["w3"].shape[0]

    mm_dtype = jnp.float32 if compute_dtype is None else compute_dtype
    w1 = params["w1"].astype(mm_dtype)
    w2 = params["w2"].astype(mm_dtype)
    b1 = params["b1"].astype(jnp.float32)
    b2 = params["b2"].astype(jnp.float32)
    b3 = params["b3"].astype(jnp.float32)

    head_on_vpu = (C == 1)
    if head_on_vpu:
        w3 = params["w3"].T.astype(jnp.float32)   # (64, 1), f32 VPU head
    else:
        w3 = params["w3"].astype(mm_dtype)        # (C, 64), MXU fallback

    num_tiles, TB, chunk, n_chunks, B_pad = _choose_tiling(B, block_batch, lane_chunk)

    # Feed x transposed (features on sublanes, batch on lanes).  With
    # allow_input_fusion below, XLA may fuse this cast/transpose/pad into the
    # pallas_call operand instead of a separate HBM pass.
    xt = x.T.astype(mm_dtype)
    if B_pad != B:
        xt = jnp.pad(xt, ((0, 0), (0, B_pad - B)))

    kernel = functools.partial(_pimanet_kernel, chunk=chunk, n_chunks=n_chunks,
                               head_on_vpu=head_on_vpu)
    resident = lambda a: pl.BlockSpec(a.shape, lambda i: (0, 0))

    out_t = pl.pallas_call(
        kernel,
        out_shape=jax.ShapeDtypeStruct((C, B_pad), jnp.float32),
        grid=(num_tiles,),
        in_specs=[
            pl.BlockSpec((8, TB), lambda i: (0, i)),   # x^T: streamed batch tiles
            resident(w1), resident(b1),                # weights/biases: VMEM-resident,
            resident(w2), resident(b2),                # DMA'd once (constant index_map)
            resident(w3), resident(b3),
        ],
        out_specs=pl.BlockSpec((C, TB), lambda i: (0, i)),   # lane-dense output
        compiler_params=pltpu.CompilerParams(
            # Independent batch tiles -> sharded across the 2 TCs on v7x.
            # TODO(synk): verify in xprof that both v7x TensorCores are active;
            # if not, switch to pltpu.CORE_PARALLEL on this axis.
            dimension_semantics=("parallel",),
            # Allow XLA to fuse the x transpose/cast/pad into operand 0.
            allow_input_fusion=[True] + [False] * 6,
            # Headroom only; the working set is ~8-13 MiB by construction.
            vmem_limit_bytes=32 * 1024 * 1024,
        ),
    )(xt, w1, b1, w2, b2, w3, b3)

    # (B, C); for C == 1 this transpose is a free reshape of a (1, B) slab.
    return out_t[:, :B].T


def init_params(key, num_classes=1):
    """PyTorch-default Linear init: U(-1/sqrt(fan_in), +1/sqrt(fan_in)),
    weights stored (out_features, in_features) like nn.Linear."""
    dims = [(8, 64), (64, 64), (64, num_classes)]
    params = {}
    for i, (fan_in, fan_out) in enumerate(dims, start=1):
        key, kw, kb = jax.random.split(key, 3)
        bound = 1.0 / jnp.sqrt(float(fan_in))
        params[f"w{i}"] = jax.random.uniform(
            kw, (fan_out, fan_in), jnp.float32, minval=-bound, maxval=bound)
        params[f"b{i}"] = jax.random.uniform(
            kb, (fan_out, 1), jnp.float32, minval=-bound, maxval=bound)
    return params


def reference_forward(x, params):
    """Pure-JAX f32 reference with PyTorch semantics (y = x @ W.T + b)."""
    h1 = jnp.maximum(x @ params["w1"].T + params["b1"][:, 0], 0.0)
    h2 = jnp.maximum(h1 @ params["w2"].T + params["b2"][:, 0], 0.0)
    return jax.nn.sigmoid(h2 @ params["w3"].T + params["b3"][:, 0])


if __name__ == "__main__":
    key = jax.random.PRNGKey(0)
    key, kx = jax.random.split(key)
    params = init_params(key, num_classes=1)

    # Small deterministic input consistent with the module (8 input features).
    batch = 8
    x = jax.random.normal(kx, (batch, 8), jnp.float32)
    ref = reference_forward(x, params)

    # f32 path: tight check against the f32 reference.
    out_f32 = jax.block_until_ready(pimanet_forward(x, params, compute_dtype=None))
    assert out_f32.shape == (batch, 1)
    err = float(jnp.max(jnp.abs(out_f32 - ref)))
    assert err < 5e-3, err

    # Default bf16-MXU path (f32 accumulation, f32 VPU head, exact sigmoid).
    out_bf16 = jax.block_until_ready(pimanet_forward(x, params))
    assert out_bf16.shape == (batch, 1)
    err = float(jnp.max(jnp.abs(out_bf16 - ref)))
    assert err < 5e-2, err

    # Exercise the multi-tile + multi-chunk path (still a small problem).
    batch2 = 2500
    key, kx2 = jax.random.split(key)
    x2 = jax.random.normal(kx2, (batch2, 8), jnp.float32)
    ref2 = reference_forward(x2, params)
    out2 = jax.block_until_ready(
        pimanet_forward(x2, params, block_batch=1024, lane_chunk=512))
    assert out2.shape == (batch2, 1)
    err2 = float(jnp.max(jnp.abs(out2 - ref2)))
    assert err2 < 5e-2, err2

    print("KERNEL_OK")
</pallas_src>

<mosaic_0001>
module attributes {stable_mosaic.version = 11 : i64} {
  func.func @_pimanet_kernel(%arg0: i32, %arg1: memref<8x128xf32, #tpu.memory_space<vmem>>, %arg2: memref<64x8xf32, #tpu.memory_space<vmem>>, %arg3: memref<64x1xf32, #tpu.memory_space<vmem>>, %arg4: memref<64x64xf32, #tpu.memory_space<vmem>>, %arg5: memref<64x1xf32, #tpu.memory_space<vmem>>, %arg6: memref<64x1xf32, #tpu.memory_space<vmem>>, %arg7: memref<1x1xf32, #tpu.memory_space<vmem>>, %arg8: memref<1x128xf32, #tpu.memory_space<vmem>>) attributes {dimension_semantics = [#tpu.dimension_semantics<parallel>], iteration_bounds = array<i64: 1>, scalar_prefetch = 0 : i64, scratch_operands = 0 : i64, tpu.core_type = #tpu.core_type<tc>, window_params = [{transform_indices = @transform_0, window_bounds = array<i64: 8, 128>}, {pipeline_mode = #tpu.pipeline_mode<synchronous>, transform_indices = @transform_1, window_bounds = array<i64: 64, 8>}, {pipeline_mode = #tpu.pipeline_mode<synchronous>, transform_indices = @transform_2, window_bounds = array<i64: 64, 1>}, {pipeline_mode = #tpu.pipeline_mode<synchronous>, transform_indices = @transform_3, window_bounds = array<i64: 64, 64>}, {pipeline_mode = #tpu.pipeline_mode<synchronous>, transform_indices = @transform_4, window_bounds = array<i64: 64, 1>}, {pipeline_mode = #tpu.pipeline_mode<synchronous>, transform_indices = @transform_5, window_bounds = array<i64: 64, 1>}, {pipeline_mode = #tpu.pipeline_mode<synchronous>, transform_indices = @transform_6, window_bounds = array<i64: 1, 1>}, {transform_indices = @transform_7, window_bounds = array<i64: 1, 128>}]} {
    %c0 = arith.constant 0 : index
    %c0_0 = arith.constant 0 : index
    %0 = vector.load %arg2[%c0, %c0_0] : memref<64x8xf32, #tpu.memory_space<vmem>>, vector<64x8xf32>
    %c0_1 = arith.constant 0 : index
    %c0_2 = arith.constant 0 : index
    %1 = vector.load %arg4[%c0_1, %c0_2] : memref<64x64xf32, #tpu.memory_space<vmem>>, vector<64x64xf32>
    %c0_3 = arith.constant 0 : index
    %c0_4 = arith.constant 0 : index
    %2 = vector.load %arg3[%c0_3, %c0_4] : memref<64x1xf32, #tpu.memory_space<vmem>>, vector<64x1xf32>
    %3 = vector.shape_cast %2 : vector<64x1xf32> to vector<64x1xf32>
    %4 = vector.broadcast %3 : vector<64x1xf32> to vector<64x128xf32>
    %c0_5 = arith.constant 0 : index
    %c0_6 = arith.constant 0 : index
    %5 = vector.load %arg5[%c0_5, %c0_6] : memref<64x1xf32, #tpu.memory_space<vmem>>, vector<64x1xf32>
    %6 = vector.shape_cast %5 : vector<64x1xf32> to vector<64x1xf32>
    %7 = vector.broadcast %6 : vector<64x1xf32> to vector<64x128xf32>
    %c0_7 = arith.constant 0 : index
    %c0_8 = arith.constant 0 : index
    %8 = vector.load %arg7[%c0_7, %c0_8] : memref<1x1xf32, #tpu.memory_space<vmem>>, vector<1x1xf32>
    %9 = vector.shape_cast %8 : vector<1x1xf32> to vector<1x1xf32>
    %10 = vector.broadcast %9 : vector<1x1xf32> to vector<1x128xf32>
    %c0_9 = arith.constant 0 : index
    %c0_10 = arith.constant 0 : index
    %11 = vector.load %arg6[%c0_9, %c0_10] : memref<64x1xf32, #tpu.memory_space<vmem>>, vector<64x1xf32>
    %12 = vector.shape_cast %11 : vector<64x1xf32> to vector<64x1xf32>
    %13 = vector.broadcast %12 : vector<64x1xf32> to vector<64x128xf32>
    %c0_11 = arith.constant 0 : index
    %c0_12 = arith.constant 0 : index
    %14 = vector.load %arg1[%c0_11, %c0_12] : memref<8x128xf32, #tpu.memory_space<vmem>>, vector<8x128xf32>
    %cst = arith.constant dense<0.000000e+00> : vector<64x128xf32>
    %15 = tpu.matmul %0, %14, %cst {dimension_numbers = #tpu.dot_dimension_numbers<[1], [0], [0], [1], [0, 0, 1, 1], [], []>} : vector<64x8xf32>, vector<8x128xf32>, vector<64x128xf32> -> vector<64x128xf32>
    %16 = arith.addf %15, %4 : vector<64x128xf32>
    %cst_13 = arith.constant 0.000000e+00 : f32
    %17 = vector.broadcast %cst_13 : f32 to vector<64x128xf32>
    %18 = arith.maximumf %16, %17 : vector<64x128xf32>
    %cst_14 = arith.constant dense<0.000000e+00> : vector<64x128xf32>
    %19 = tpu.matmul %1, %18, %cst_14 {dimension_numbers = #tpu.dot_dimension_numbers<[1], [0], [0], [1], [0, 0, 1, 1], [], []>} : vector<64x64xf32>, vector<64x128xf32>, vector<64x128xf32> -> vector<64x128xf32>
    %20 = arith.addf %19, %7 : vector<64x128xf32>
    %cst_15 = arith.constant 0.000000e+00 : f32
    %21 = vector.broadcast %cst_15 : f32 to vector<64x128xf32>
    %22 = arith.maximumf %20, %21 : vector<64x128xf32>
    %23 = arith.mulf %13, %22 : vector<64x128xf32>
    %cst_16 = arith.constant dense<0.000000e+00> : vector<128xf32>
    %24 = vector.multi_reduction <add>, %23, %cst_16 [0] : vector<64x128xf32> to vector<128xf32>
    %25 = vector.shape_cast %24 : vector<128xf32> to vector<1x128xf32>
    %26 = arith.addf %25, %10 : vector<1x128xf32>
    %cst_17 = arith.constant 0.000000e+00 : f32
    %27 = vector.broadcast %cst_17 : f32 to vector<1x128xf32>
    %28 = arith.subf %27, %26 : vector<1x128xf32>
    %29 = math.exp %28 : vector<1x128xf32>
    %cst_18 = arith.constant 1.000000e+00 : f32
    %30 = vector.broadcast %cst_18 : f32 to vector<1x128xf32>
    %31 = arith.addf %30, %29 : vector<1x128xf32>
    %cst_19 = arith.constant 1.000000e+00 : f32
    %32 = vector.broadcast %cst_19 : f32 to vector<1x128xf32>
    %33 = arith.divf %32, %31 : vector<1x128xf32>
    %c0_20 = arith.constant 0 : index
    %c0_21 = arith.constant 0 : index
    %34 = vector.load %arg8[%c0_20, %c0_21] : memref<1x128xf32, #tpu.memory_space<vmem>>, vector<1x128xf32>
    tpu.vector_store %arg8[%c0_20, %c0_21], %33 {strides = array<i32>} : memref<1x128xf32, #tpu.memory_space<vmem>>, vector<1x128xf32>,
    return
  }
  func.func @transform_0(%arg0: i32) -> (i32, i32) {
    %c0_i32 = arith.constant 0 : i32
    %c0_i32_0 = arith.constant 0 : i32
    return %c0_i32, %arg0 : i32, i32
  }
  func.func @transform_1(%arg0: i32) -> (i32, i32) {
    %c0_i32 = arith.constant 0 : i32
    %c0_i32_0 = arith.constant 0 : i32
    %c0_i32_1 = arith.constant 0 : i32
    return %c0_i32, %c0_i32_0 : i32, i32
  }
  func.func @transform_2(%arg0: i32) -> (i32, i32) {
    %c0_i32 = arith.constant 0 : i32
    %c0_i32_0 = arith.constant 0 : i32
    %c0_i32_1 = arith.constant 0 : i32
    return %c0_i32, %c0_i32_0 : i32, i32
  }
  func.func @transform_3(%arg0: i32) -> (i32, i32) {
    %c0_i32 = arith.constant 0 : i32
    %c0_i32_0 = arith.constant 0 : i32
    %c0_i32_1 = arith.constant 0 : i32
    return %c0_i32, %c0_i32_0 : i32, i32
  }
  func.func @transform_4(%arg0: i32) -> (i32, i32) {
    %c0_i32 = arith.constant 0 : i32
    %c0_i32_0 = arith.constant 0 : i32
    %c0_i32_1 = arith.constant 0 : i32
    return %c0_i32, %c0_i32_0 : i32, i32
  }
  func.func @transform_5(%arg0: i32) -> (i32, i32) {
    %c0_i32 = arith.constant 0 : i32
    %c0_i32_0 = arith.constant 0 : i32
    %c0_i32_1 = arith.constant 0 : i32
    return %c0_i32, %c0_i32_0 : i32, i32
  }
  func.func @transform_6(%arg0: i32) -> (i32, i32) {
    %c0_i32 = arith.constant 0 : i32
    %c0_i32_0 = arith.constant 0 : i32
    %c0_i32_1 = arith.constant 0 : i32
    return %c0_i32, %c0_i32_0 : i32, i32
  }
  func.func @transform_7(%arg0: i32) -> (i32, i32) {
    %c0_i32 = arith.constant 0 : i32
    %c0_i32_0 = arith.constant 0 : i32
    return %c0_i32, %arg0 : i32, i32
  }
}

</mosaic_0001>

<bundles_post_ra>
// kernel: tpu_custom_call.1
= control target key start
LH: loop header
LB: loop body
LE: loop exit
PB: predicated region body
PF: predicated region fallthrough
CT: control target
= control target key end

     0   :  { %s854_s0 = inlined_call_operand.vmem [shape: f32[8,128], index: 0, kind: input, shape index: {}]   ;;  %s855_s1 = inlined_call_operand.vmem [shape: f32[64,8], index: 1, kind: input, shape index: {}]   ;;  %s856_s2 = inlined_call_operand.vmem [shape: f32[64,1], index: 2, kind: input, shape index: {}]   ;;  %s857_s3 = inlined_call_operand.vmem [shape: f32[64,64], index: 3, kind: input, shape index: {}]   ;;  %s858_s4 = inlined_call_operand.vmem [shape: f32[64,1], index: 4, kind: input, shape index: {}]   ;;  %s859_s5 = inlined_call_operand.vmem [shape: f32[64,1], index: 5, kind: input, shape index: {}]   ;;  %s860_s6 = inlined_call_operand.<no memory space> [shape: f32[1,1], index: 6, kind: input, shape index: {}]   ;;  %s861_s7 = inlined_call_operand.hbm [shape: f32[1,128], index: 7, kind: output, shape index: {}]  }
   0x1   :  { %v12_v0 = vstv %s860_s6 }
   0x2   :  { %13 = vst [vmem:[#allocation2] sm:$0x1] %v12_v0 }
   0x3   :  { %v199_v1 = vld [vmem:[%s854_s0] sm:$0xff]  ;;  %vm200_vm0 = vcmask 64512   ;;  %v30_v3 = vld [vmem:[%s855_s1 + $0x8] sm:$0xff]  ;;  %v31_v4 = vld [vmem:[%s855_s1 + $0x10] sm:$0xff]  ;;  %v658_v5 = vmov 0  }
   0x4   :  { %v29_v2 = vld [vmem:[%s855_s1] sm:$0xff]  ;;  %560 = vmatprep.subr.mxu0 %v199_v1  ;;  %628 = vset.pattern.permute.xlu0 %v658_v5  ;;  %v47_v7 = vld [vmem:[%s856_s2 + $0x10] sm:$0xff]  ;;  %v32_v8 = vld [vmem:[%s855_s1 + $0x18] sm:$0xff] }
   0x5   :  { %562 = vmatprep.mubr.msk.f32.mxu0 %vm200_vm0, %v29_v2  ;;  %561 = vmatpush3.msra.mxu0 %v199_v1  ;;  %v45_v6 = vld [vmem:[%s856_s2] sm:$0xff]  ;;  %v46_v10 = vld [vmem:[%s856_s2 + $0x8] sm:$0xff]  ;;  %v48_v11 = vld [vmem:[%s856_s2 + $0x18] sm:$0xff] }
   0x6   :  { %563 = vmatmul.mubr.msk.f32.vlgmr.msra.gmra.mrb[0].mxu0 %vm200_vm0, %v30_v3  ;;  %629 = vset.pattern.permute.xlu1 %v658_v5  ;;  %v33_v9 = vld [vmem:[%s855_s1 + $0x20] sm:$0xff]  ;;  %v34_v12 = vld [vmem:[%s855_s1 + $0x28] sm:$0xff]  ;;  %v35_v13 = vld [vmem:[%s855_s1 + $0x30] sm:$0xff] }
   0x7   :  { %565 = vmatprep.mubr.msk.f32.mxu0 %vm200_vm0, %v31_v4  ;;  %55 = vperm.xlu0 %628, %v45_v6   ;;  %v49_v14 = vld [vmem:[%s856_s2 + $0x20] sm:$0xff]  ;;  %v50_v15 = vld [vmem:[%s856_s2 + $0x28] sm:$0xff] }
   0x8   :  { %65 = vperm.xlu1 %629, %v47_v7  }
   0xa   :  { %566 = vmatmul.mubr.msk.f32.gmra.mrb[2].mxu0 %vm200_vm0, %v32_v8 }
   0xb   :  { %568 = vmatprep.mubr.msk.f32.mxu0 %vm200_vm0, %v33_v9  ;;  %60 = vperm.xlu0 %628, %v46_v10  }
   0xc   :  { %70 = vperm.xlu1 %629, %v48_v11  }
   0xe   :  { %569 = vmatmul.mubr.msk.f32.gmra.mrb[4].mxu0 %vm200_vm0, %v34_v12 }
   0xf   :  { %14 = vsyncpa [#allocation4], 0  ;;  %571 = vmatprep.mubr.msk.f32.mxu0 %vm200_vm0, %v35_v13  ;;  %v36_v16 = vld [vmem:[%s855_s1 + $0x38] sm:$0xff]  ;;  %75 = vperm.xlu0 %628, %v49_v14   ;;  %v51_v17 = vld [vmem:[%s856_s2 + $0x30] sm:$0xff]  ;;  %vm338_vm1 = vcmask 523264  }
  0x10   :  { %80 = vperm.xlu1 %629, %v50_v15   ;;  %v52_v18 = vld [vmem:[%s856_s2 + $0x38] sm:$0xff]  ;;  %v93_v19 = vld [vmem:[%s858_s4] sm:$0xff]  ;;  %v94_v20 = vld [vmem:[%s858_s4 + $0x8] sm:$0xff] }
  0x11   :  { %v95_v21 = vld [vmem:[%s858_s4 + $0x10] sm:$0xff]  ;;  %v96_v22 = vld [vmem:[%s858_s4 + $0x18] sm:$0xff]  ;;  %v151_v23 = vld [vmem:[%s859_s5] sm:$0xff] }
  0x12   :  { %572 = vmatmul.mubr.msk.f32.gmra.mrb[6].mxu0 %vm200_vm0, %v36_v16  ;;  %v152_v24 = vld [vmem:[%s859_s5 + $0x8] sm:$0xff]  ;;  %v97_v25 = vld [vmem:[%s858_s4 + $0x20] sm:$0xff]  ;;  %v153_v26 = vld [vmem:[%s859_s5 + $0x10] sm:$0xff] }
  0x13   :  { %85 = vperm.xlu0 %628, %v51_v17   ;;  %v98_v27 = vld [vmem:[%s858_s4 + $0x28] sm:$0xff]  ;;  %v154_v28 = vld [vmem:[%s859_s5 + $0x18] sm:$0xff]  ;;  %v99_v29 = vld [vmem:[%s858_s4 + $0x30] sm:$0xff] }
  0x14   :  { %90 = vperm.xlu1 %629, %v52_v18   ;;  %v155_v30 = vld [vmem:[%s859_s5 + $0x20] sm:$0xff]  ;;  %v100_v31 = vld [vmem:[%s858_s4 + $0x38] sm:$0xff]  ;;  %v156_v32 = vld [vmem:[%s859_s5 + $0x28] sm:$0xff] }
  0x15   :  { %v157_v33 = vld [vmem:[%s859_s5 + $0x30] sm:$0xff]  ;;  %v158_v34 = vld [vmem:[%s859_s5 + $0x38] sm:$0xff]  ;;  %v141_v35 = vld [vmem:[#allocation2] sm:$0x1] }
  0x16   :  { %v37_v36 = vld [vmem:[%s857_s3] sm:$0xff]  ;;  %v39_v37 = vld [vmem:[%s857_s3 + $0x10] sm:$0xff]  ;;  %v38_v10 = vld [vmem:[%s857_s3 + $0x8] sm:$0xff] }
  0x17   :  { %103 = vperm.xlu0 %628, %v93_v19   ;;  %590 = vmatprep.mubr.msk.f32.mxu0 %vm338_vm1, %v37_v36  ;;  %v40_v11 = vld [vmem:[%s857_s3 + $0x18] sm:$0xff]  ;;  %v41_v12 = vld [vmem:[%s857_s3 + $0x20] sm:$0xff]  ;;  %v42_v13 = vld [vmem:[%s857_s3 + $0x28] sm:$0xff] }
  0x18   :  { %108 = vperm.xlu1 %629, %v94_v20   ;;  %593 = vmatprep.mubr.msk.f32.mxu1 %vm338_vm1, %v39_v37  ;;  %v43_v14 = vld [vmem:[%s857_s3 + $0x30] sm:$0xff]  ;;  %v44_v15 = vld [vmem:[%s857_s3 + $0x38] sm:$0xff]  ;;  %s659_s3 = smov [#allocation3]  }
  0x19   :  { %s511_s27 = sshll.u32 %s659_s3, 4  ;;  %s512_s27 = int_to_ptr.vmem [resolvable:$true] %s511_s27 }
  0x1a   :  { %s634_s28 = scalar_lea.vmem %s512_s27, 16  ;;  %s638_s29 = scalar_lea.vmem %s512_s27, 32 }
  0x1b   :  { %113 = vperm.xlu0 %628, %v95_v21   ;;  %p635_p0 = scmp.ne.s32.totalorder %s512_s27, %s634_s28  ;;  %p639_p1 = scmp.lt.s32.totalorder %s512_s27, %s512_s27 }
  0x1c   :  { %118 = vperm.xlu1 %629, %v96_v22   ;;  %p640_p2 = scmp.lt.s32.totalorder %s638_s29, %s634_s28 }
  0x1e   :  { %p641_p3 = por %p640_p2, %p639_p1 }
  0x1f   :  { %161 = vperm.xlu0 %628, %v151_v23  }
  0x20   :  { %166 = vperm.xlu1 %629, %v152_v24   ;;  %p642_p4 = pnand %p641_p3, %p635_p0 }
  0x23   :  { %123 = vperm.xlu0 %628, %v97_v25  }
  0x24   :  { %171 = vperm.xlu1 %629, %v153_v26  }
  0x27   :  { %128 = vperm.xlu0 %628, %v98_v27  }
  0x28   :  { %176 = vperm.xlu1 %629, %v154_v28  }
  0x2b   :  { %133 = vperm.xlu0 %628, %v99_v29  }
  0x2c   :  { %181 = vperm.xlu1 %629, %v155_v30  }
  0x2f   :  { %138 = vperm.xlu0 %628, %v100_v31  }
  0x30   :  { %186 = vperm.xlu1 %629, %v156_v32  }
  0x33   :  { %191 = vperm.xlu0 %628, %v157_v33  }
  0x34   :  { %196 = vperm.xlu1 %629, %v158_v34  }
  0x37   :  { %144 = vperm.xlu0 %628, %v141_v35  }
  0x86   :  { %v56_v38 = vpop.permute.xlu0 %55 }
  0x87   :  { %v66_v39 = vpop.permute.xlu1 %65 }
  0x8a   :  { %v61_v40 = vpop.permute.xlu0 %60 }
  0x8b   :  { %v71_v41 = vpop.permute.xlu1 %70 }
  0x8e   :  { %v76_v54 = vpop.permute.xlu0 %75 }
  0x8f   :  { %v81_v51 = vpop.permute.xlu1 %80 }
  0x92   :  { %v86_v2 = vpop.permute.xlu0 %85 }
  0x93   :  { %v91_v63 = vpop.permute.xlu1 %90 }
  0x96   :  { %v104_v16 = vpop.permute.xlu0 %103 }
  0x97   :  { %v109_v17 = vpop.permute.xlu1 %108 }
  0x9a   :  { %v114_v18 = vpop.permute.xlu0 %113 }
  0x9b   :  { %v119_v19 = vpop.permute.xlu1 %118 }
  0x9e   :  { %v162_v20 = vpop.permute.xlu0 %161 }
  0x9f   :  { %v167_v21 = vpop.permute.xlu1 %166 }
  0xa2   :  { %v124_v22 = vpop.permute.xlu0 %123 }
  0xa3   :  { %v172_v23 = vpop.permute.xlu1 %171 }
  0xa6   :  { %v129_v24 = vpop.permute.xlu0 %128 }
  0xa7   :  { %v177_v25 = vpop.permute.xlu1 %176 }
  0xaa   :  { %v134_v34 = vpop.permute.xlu0 %133 }
  0xd9   :  { %v564_v42 = vpop.f32.mrb[0].mxu0 }
  0xda   :  { %v297_v43 = vadd.f32 %v564_v42, %v61_v40  ;;  %v291_v44 = vpop.f32.mrb[1].mxu0 }
  0xdb   :  { %v292_v45 = vadd.f32 %v291_v44, %v56_v38 }
  0xdc   :  { %v331_v46 = vmax.f32 %v297_v43, 0.0 }
  0xdd   :  { %v330_v47 = vmax.f32 %v292_v45, 0.0  ;;  %v567_v48 = vpop.f32.mrb[2].mxu0 }
  0xde   :  { %v307_v49 = vadd.f32 %v567_v48, %v71_v41  ;;  %v301_v50 = vpop.f32.mrb[3].mxu0 }
  0xdf   :  { %v602_v52 = vpack.c.bf16 %v331_v46, %v330_v47  ;;  %v302_v53 = vadd.f32 %v301_v50, %v66_v39  ;;  %v182_v39 = vpop.permute.xlu1 %181  ;;  %v139_v50 = vpop.permute.xlu0 %138 }
  0xe0   :  { %v333_v55 = vmax.f32 %v307_v49, 0.0 }
  0xe1   :  { %v332_v56 = vmax.f32 %v302_v53, 0.0  ;;  %v570_v57 = vpop.f32.mrb[4].mxu0  ;;  %603 = vmatprep.subr.bf16.mxu0 %v602_v52  ;;  %618 = vmatprep.subr.bf16.mxu1 %v602_v52 }
  0xe2   :  { %v317_v58 = vadd.f32 %v570_v57, %v81_v51  ;;  %v311_v59 = vpop.f32.mrb[5].mxu0  ;;  %605 = vmatpush3.bf16.msra.mxu0 %v602_v52  ;;  %622 = vmatpush3.bf16.msra.mxu1 %v602_v52 }
  0xe3   :  { %v606_v60 = vpack.c.bf16 %v333_v55, %v332_v56  ;;  %v312_v61 = vadd.f32 %v311_v59, %v76_v54  ;;  %v187_v57 = vpop.permute.xlu1 %186 }
  0xe4   :  { %v335_v62 = vmax.f32 %v317_v58, 0.0 }
  0xe5   :  { %v334_v0 = vmax.f32 %v312_v61, 0.0  ;;  %v573_v1 = vpop.f32.mrb[6].mxu0  ;;  %607 = vmatprep.subr.bf16.mxu0 %v606_v60  ;;  %619 = vmatprep.subr.bf16.mxu1 %v606_v60 }
  0xe6   :  { %v327_v3 = vadd.f32 %v573_v1, %v91_v63  ;;  %v321_v4 = vpop.f32.mrb[7].mxu0  ;;  %609 = vmatpush3.bf16.msra.mxu0 %v606_v60  ;;  %623 = vmatpush3.bf16.msra.mxu1 %v606_v60 }
  0xe7   :  { %v610_v5 = vpack.c.bf16 %v335_v62, %v334_v0  ;;  %v322_v6 = vadd.f32 %v321_v4, %v86_v2  ;;  %v192_v0 = vpop.permute.xlu0 %191 }
  0xe8   :  { %v337_v7 = vmax.f32 %v327_v3, 0.0  ;;  %v197_v3 = vpop.permute.xlu1 %196 }
  0xe9   :  { %v336_v8 = vmax.f32 %v322_v6, 0.0  ;;  %611 = vmatprep.subr.bf16.mxu0 %v610_v5  ;;  %620 = vmatprep.subr.bf16.mxu1 %v610_v5  ;;  %v147_v6 = vlaneseq }
  0xea   :  { %613 = vmatpush3.bf16.msra.mxu0 %v610_v5  ;;  %624 = vmatpush3.bf16.msra.mxu1 %v610_v5 }
  0xeb   :  { %v614_v9 = vpack.c.bf16 %v337_v7, %v336_v8 }
  0xed   :  { %615 = vmatprep.subr.bf16.mxu0 %v614_v9  ;;  %621 = vmatprep.subr.bf16.mxu1 %v614_v9 }
  0xee   :  { %617 = vmatpush3.bf16.msra.mxu0 %v614_v9  ;;  %625 = vmatpush3.bf16.msra.mxu1 %v614_v9  ;;  %v148_v9 = vshrl.u32 %v147_v6, 7 }
  0xf1   :  { %591 = vmatmul.mubr.msk.f32.vlgmr.msra.gmra.mrb[8].mxu0 %vm338_vm1, %v38_v10  ;;  %594 = vmatmul.mubr.msk.f32.vlgmr.msra.gmra.mrb[0].mxu1 %vm338_vm1, %v40_v11 }
  0xf2   :  { %596 = vmatprep.mubr.msk.f32.mxu1 %vm338_vm1, %v41_v12  ;;  %v149_v12 = vsub.s32 0, %v148_v9 }
  0xf5   :  { %597 = vmatmul.mubr.msk.f32.gmra.mrb[2].mxu1 %vm338_vm1, %v42_v13 }
  0xf6   :  { %599 = vmatprep.mubr.msk.f32.mxu1 %vm338_vm1, %v43_v14  ;;  %v145_v14 = vpop.permute.xlu0 %144 }
  0xf9   :  { %600 = vmatmul.mubr.msk.f32.gmra.mrb[4].mxu1 %vm338_vm1, %v44_v15 }
 0x1c4   :  { %v592_v26 = vpop.f32.mrb[8].mxu0  ;;  %v595_v27 = vpop.f32.mrb[0].mxu1 }
 0x1c5   :  { %v435_v28 = vadd.f32 %v592_v26, %v109_v17  ;;  %v445_v29 = vadd.f32 %v595_v27, %v119_v19  ;;  %v429_v30 = vpop.f32.mrb[9].mxu0  ;;  %v439_v31 = vpop.f32.mrb[1].mxu1 }
 0x1c6   :  { %v430_v32 = vadd.f32 %v429_v30, %v104_v16  ;;  %v440_v33 = vadd.f32 %v439_v31, %v114_v18  ;;  %v150_v16 = vrot.slane %v145_v14, %v149_v12 }
 0x1c7   :  { %v469_v35 = vmax.f32 %v435_v28, 0.0  ;;  %v471_v41 = vmax.f32 %v445_v29, 0.0 }
 0x1c8   :  { %v468_v36 = vmax.f32 %v430_v32, 0.0  ;;  %v470_v37 = vmax.f32 %v440_v33, 0.0  ;;  %v598_v38 = vpop.f32.mrb[2].mxu1 }
 0x1c9   :  { %v477_v40 = vmul.f32 %v469_v35, %v167_v21  ;;  %v449_v42 = vpop.f32.mrb[3].mxu1  ;;  %v455_v44 = vadd.f32 %v598_v38, %v129_v24  ;;  %v479_v51 = vmul.f32 %v471_v41, %v177_v25 }
 0x1ca   :  { %v476_v43 = vmul.f32 %v468_v36, %v162_v20  ;;  %v450_v45 = vadd.f32 %v449_v42, %v124_v22  ;;  %v478_v47 = vmul.f32 %v470_v37, %v172_v23 }
 0x1cb   :  { %v473_v54 = vmax.f32 %v455_v44, 0.0 }
 0x1cc   :  { %v484_v46 = vadd.f32 %v477_v40, %v476_v43  ;;  %v472_v48 = vmax.f32 %v450_v45, 0.0  ;;  %v601_v49 = vpop.f32.mrb[4].mxu1 }
 0x1cd   :  { %v459_v52 = vpop.f32.mrb[5].mxu1  ;;  %v465_v55 = vadd.f32 %v601_v49, %v139_v50  ;;  %v481_v61 = vmul.f32 %v473_v54, %v187_v57 }
 0x1ce   :  { %v485_v53 = vadd.f32 %v484_v46, %v478_v47  ;;  %v460_v56 = vadd.f32 %v459_v52, %v134_v34  ;;  %v480_v58 = vmul.f32 %v472_v48, %v182_v39 }
 0x1cf   :  { %v475_v63 = vmax.f32 %v465_v55, 0.0 }
 0x1d0   :  { %v486_v59 = vadd.f32 %v485_v53, %v479_v51  ;;  %v474_v60 = vmax.f32 %v460_v56, 0.0 }
 0x1d1   :  { %v483_v4 = vmul.f32 %v475_v63, %v197_v3 }
 0x1d2   :  { %v487_v62 = vadd.f32 %v486_v59, %v480_v58  ;;  %v482_v1 = vmul.f32 %v474_v60, %v192_v0 }
 0x1d4   :  { %v488_v2 = vadd.f32 %v487_v62, %v481_v61 }
 0x1d6   :  { %v489_v5 = vadd.f32 %v488_v2, %v482_v1 }
 0x1d8   :  { %v490_v7 = vadd.f32 %v489_v5, %v483_v4 }
 0x1da   :  { %v491_v8 = vrot.slane %v490_v7, 4 }
 0x1dc   :  { %v492_v10 = vadd.f32 %v491_v8, %v490_v7 }
 0x1de   :  { %v493_v11 = vrot.slane %v492_v10, 2 }
 0x1e0   :  { %v494_v13 = vadd.f32 %v493_v11, %v492_v10 }
 0x1e2   :  { %v495_v15 = vrot.slane %v494_v13, 1 }
 0x1e4   :  { %v496_v17 = vadd.f32 %v495_v15, %v494_v13 }
 0x1e6   :  { %v497_v18 = vadd.f32 %v496_v17, %v150_v16 }
 0x1e8   :  { %v498_v19 = vsub.f32 0.0, %v497_v18 }
 0x1ea   :  { %v499_v20 = vmul.f32 1.442695, %v498_v19 }
 0x1ec   :  { %630 = vpow2.f32 %v499_v20 }
 0x1f6   :  { %v631_v21 = vpop.eup %630 }
 0x1f7   :  { %v501_v22 = vadd.f32 1.0, %v631_v21 }
 0x1f9   :  { %632 = vrcp.f32 %v501_v22 }
 0x203   :  { %v633_v23 = vpop.eup %632 }
 0x204   :  { %504 = vst [vmem:[#allocation3] sm:$0x1] %v633_v23 }
 0x205   :  { %645 = shalt.err (!%p642_p4)
}
 0x206   :  { %s646_s9 = scalar_lea.hbm %s861_s7, 16 }
 0x207   :  { %p647_p5 = scmp.ne.s32.totalorder %s861_s7, %s646_s9  ;;  %p650_p6 = scmp.lt.u32.totalorder %s646_s9, %s861_s7 }
 0x209   :  { %p652_p7 = pnand %p650_p6, %p647_p5 }
 0x20b   :  { %655 = shalt.err (!%p652_p7)
}
 0x20c   :  { %514 = dma.vmem_to_hbm [thread:$0]  %s512_s27, 16, %s861_s7, [#allocation4]  }
 0x20d   :  { %656 = dma.done.wait [#allocation4], 16  }
 0x20e   :  { %657 = vsyncadd [#allocation4], 4294967280 }
 0x20f   :  { %518 = vsyncpa [#allocation4], 1 }

</bundles_post_ra>
